<compile_context>
chip_gen: v5e
topology: v5e:2x2
jax: 0.10.0
libtpu: 0.0.40
codegen_flags: <defaults>
</compile_context>

<pallas_src>
import functools

import jax
import jax.numpy as jnp
from jax.experimental import pallas as pl
from jax.experimental.pallas import tpu as pltpu


def _cdiv(a, b):
    return -(-a // b)


def _round_up(x, m):
    return _cdiv(x, m) * m


def _pick_row_fold(nc, s, esize, max_rows=256):
    """Smallest f dividing s with nc*f >= sublane target (8 for f32, 16 for
    bf16) and s//f >= 128, so small-nc inputs fill the vreg sublanes."""
    target = 8 * max(1, 4 // max(1, esize))
    if nc >= target or s < 2 * 128:
        return 1
    limit = min(max_rows // max(1, nc), s // 128)
    for f in range(_cdiv(target, nc), limit + 1):
        if s % f == 0:
            return f
    return 1


def _lane_fold(x, f):
    """(rows, f*128) -> (rows, 128): sum groups of 128 lanes via a pairwise
    tree of vreg-column-aligned static slices.  Pure VPU adds, no XLU."""
    parts = [x[:, i * 128:(i + 1) * 128] for i in range(f)]
    while len(parts) > 1:
        nxt = [parts[i] + parts[i + 1] for i in range(0, len(parts) - 1, 2)]
        if len(parts) % 2:
            nxt.append(parts[-1])
        parts = nxt
    return parts[0]


def _tversky_bce_kernel(pred_ref, target_ref, out_ref, acc_ref, *,
                        lanes_total, tile_s, k_steps, ragged):
    pc = pl.program_id(0)
    k = pl.program_id(1)
    f = tile_s // 128

    @pl.when(k == 0)
    def _init():
        acc_ref[...] = jnp.zeros_like(acc_ref)   # narrow: (4, rows, 128)

    def accumulate(mask):
        p = pred_ref[...].astype(jnp.float32)    # native-dtype HBM stream
        t = target_ref[...].astype(jnp.float32)
        if mask is not None:
            # Boundary tile: out-of-bounds block data is undefined — zero
            # p/t before the Tversky sums, and the BCE term afterwards.
            p = jnp.where(mask, p, 0.0)
            t = jnp.where(mask, t, 0.0)
        pt = p * t
        # BCE(sigmoid(p), t) in canonical logits form, reusing p*t:
        #   bce = relu(p) - p*t + log(1 + exp(-|p|))    (2 EUP ops / element)
        # PyTorch BCELoss's log clamp at -100 only differs for |p| >~ 100.
        bce = jnp.maximum(p, 0.0) - pt + jnp.log(1.0 + jnp.exp(-jnp.abs(p)))
        if mask is not None:
            bce = jnp.where(mask, bce, 0.0)
        # Narrow per-lane-group accumulators: tiny VMEM round-trip per step.
        acc_ref[0] += _lane_fold(pt, f)    # TP
        acc_ref[1] += _lane_fold(p, f)     # sum(pred)
        acc_ref[2] += _lane_fold(t, f)     # sum(target)
        acc_ref[3] += _lane_fold(bce, f)   # sum(bce)

    if ragged:
        base = (pc * k_steps + k) * tile_s
        is_tail = base + tile_s > lanes_total

        @pl.when(jnp.logical_not(is_tail))
        def _steady():
            accumulate(None)

        @pl.when(is_tail)
        def _tail():
            lane = jax.lax.broadcasted_iota(
                jnp.int32, (acc_ref.shape[1], tile_s), 1)
            accumulate(base + lane < lanes_total)
    else:
        accumulate(None)

    @pl.when(k == pl.num_programs(1) - 1)
    def _finalize():
        out_ref[...] = acc_ref[...]          # single lane-dense packed output


def tversky_loss(pred, target, *, alpha=0.3, beta=0.7, smooth=1.0,
                 bce_weight=1.0, block_bytes=2 * 1024 * 1024, num_chunks=2,
                 vmem_limit_bytes=48 * 1024 * 1024):
    """Pallas TPU implementation of TverskyLoss.forward (returns a scalar).

    Per-generation tuning:
      * v5e / v6e: num_chunks=1, block_bytes up to 8-16 MiB (128 MiB VMEM).
      * v7x:       num_chunks=2 (two TensorCores), block_bytes ~4 MiB, keep
                   vmem_limit_bytes <= ~48 MiB (64 MiB VMEM per core).
    """
    assert pred.shape == target.shape and pred.ndim >= 3
    n, c = int(pred.shape[0]), int(pred.shape[1])
    s = 1
    for dim in pred.shape[2:]:
        s *= int(dim)
    nc = n * c
    total = nc * s

    esize = max(jnp.dtype(pred.dtype).itemsize,
                jnp.dtype(target.dtype).itemsize)

    # Sublane fill for small nc: fold a spatial factor into the row axis.
    row_fold = _pick_row_fold(nc, s, esize)
    rows = nc * row_fold
    lanes = s // row_fold

    pred2 = pred.reshape(rows, lanes)       # free reshape, native dtype stream
    target2 = target.reshape(rows, lanes)

    # Spatial tile: ~block_bytes per input block, multiple of 128 lanes.
    max_tile = max(128, (block_bytes // max(1, rows * esize)) // 128 * 128)
    tile_s = max(128, min(max_tile, _round_up(lanes, 128)))
    nblocks = _cdiv(lanes, tile_s)                 # real (possibly partial) tiles
    chunks = max(1, min(num_chunks, nblocks))      # "parallel" streaming chunks
    k_steps = _cdiv(nblocks, chunks)
    ragged = (chunks * k_steps * tile_s != lanes)
    last_block = nblocks - 1

    def lane_block(pc, k):
        j = pc * k_steps + k
        if ragged:
            # Tiles past the boundary re-read the last real tile; their
            # contribution is zeroed by the in-kernel mask.
            j = jnp.minimum(j, last_block)
        return (0, j)

    kernel = functools.partial(
        _tversky_bce_kernel,
        lanes_total=lanes, tile_s=tile_s, k_steps=k_steps, ragged=ragged)

    in_spec = pl.BlockSpec((rows, tile_s), lane_block)
    out_spec = pl.BlockSpec((None, 4, rows, 128), lambda pc, k: (pc, 0, 0, 0))

    parts = pl.pallas_call(
        kernel,
        out_shape=jax.ShapeDtypeStruct((chunks, 4, rows, 128), jnp.float32),
        grid_spec=pltpu.PrefetchScalarGridSpec(
            num_scalar_prefetch=0,
            grid=(chunks, k_steps),
            in_specs=[in_spec, in_spec],
            out_specs=out_spec,
            scratch_shapes=[pltpu.VMEM((4, rows, 128), jnp.float32)],
        ),
        compiler_params=pltpu.CompilerParams(
            dimension_semantics=("parallel", "arbitrary"),
            vmem_limit_bytes=vmem_limit_bytes),
    )(pred2, target2)

    # Tiny cross-chunk / cross-lane / row-unfold combine in plain JAX.
    sums = jnp.sum(parts, axis=(0, 3))                      # (4, rows)
    sums = jnp.sum(sums.reshape(4, nc, row_fold), axis=2)   # (4, nc)
    tp, ps, ts = sums[0], sums[1], sums[2]
    bce_sum = jnp.sum(sums[3])
    fn = ps - tp          # sum(pred * (1 - target))
    fp = ts - tp          # sum((1 - pred) * target)
    tversky = tp / (tp + alpha * fn + beta * fp + smooth)
    # mean_n(1 - mean_c T_{n,c}) == 1 - mean_{n,c} T_{n,c}
    tv_loss = jnp.clip(1.0 - jnp.mean(tversky), 0.0, 1.0)
    return tv_loss + bce_weight * (bce_sum / total)


def tversky_loss_ref(pred, target, *, alpha=0.3, beta=0.7, smooth=1.0,
                     bce_weight=1.0):
    """Pure-JAX reference mirroring the PyTorch module."""
    pred = pred.astype(jnp.float32)
    target = target.astype(jnp.float32)
    axes = tuple(range(2, pred.ndim))
    tp = jnp.sum(pred * target, axis=axes)
    fp = jnp.sum((1.0 - pred) * target, axis=axes)
    fn = jnp.sum(pred * (1.0 - target), axis=axes)
    tversky = jnp.mean(tp / (tp + alpha * fn + beta * fp + smooth), axis=1)
    tv_loss = jnp.clip(jnp.mean(1.0 - tversky), 0.0, 1.0)
    x = jax.nn.sigmoid(pred)
    bce = -(target * jnp.maximum(jnp.log(x), -100.0)
            + (1.0 - target) * jnp.maximum(jnp.log(1.0 - x), -100.0))
    return tv_loss + bce_weight * jnp.mean(bce)


if __name__ == "__main__":
    key = jax.random.PRNGKey(0)
    keys = jax.random.split(key, 6)

    # Case 1: tile-aligned f32 inputs, NCDHW = (2, 4, 4, 8, 16) -> nc=8, s=512.
    shape1 = (2, 4, 4, 8, 16)
    pred1 = jax.random.normal(keys[0], shape1, dtype=jnp.float32)
    targ1 = jax.random.bernoulli(keys[1], 0.5, shape1).astype(jnp.float32)
    out1 = jax.block_until_ready(tversky_loss(pred1, targ1))
    ref1 = jax.block_until_ready(tversky_loss_ref(pred1, targ1))
    assert jnp.isfinite(out1), "non-finite loss (case 1)"
    assert jnp.allclose(out1, ref1, rtol=1e-5, atol=1e-5), (out1, ref1)

    # Case 2: tiny ragged spatial size + bf16 streaming (in-kernel tail mask).
    shape2 = (1, 3, 3, 5, 7)
    pred2 = jax.random.normal(keys[2], shape2,
                              dtype=jnp.float32).astype(jnp.bfloat16)
    targ2 = jax.random.bernoulli(keys[3], 0.5, shape2).astype(jnp.bfloat16)
    out2 = jax.block_until_ready(tversky_loss(pred2, targ2))
    ref2 = jax.block_until_ready(tversky_loss_ref(pred2, targ2))
    assert jnp.isfinite(out2), "non-finite loss (case 2)"
    assert jnp.allclose(out2, ref2, rtol=1e-5, atol=1e-5), (out2, ref2)

    # Case 3: small nc (row folding), 2 parallel chunks, multiple reduction
    # steps, a partial tail tile and a fully-masked duplicate tile (tiny
    # block_bytes forces the multi-step pipeline at this small shape).
    shape3 = (1, 2, 8, 16, 17)   # nc=2, s=2176 -> rows=8, lanes=544
    pred3 = jax.random.normal(keys[4], shape3, dtype=jnp.float32)
    targ3 = jax.random.bernoulli(keys[5], 0.5, shape3).astype(jnp.float32)
    out3 = jax.block_until_ready(
        tversky_loss(pred3, targ3, block_bytes=4 * 1024, num_chunks=2))
    ref3 = jax.block_until_ready(tversky_loss_ref(pred3, targ3))
    assert jnp.isfinite(out3), "non-finite loss (case 3)"
    assert jnp.allclose(out3, ref3, rtol=1e-5, atol=1e-5), (out3, ref3)

    print("KERNEL_OK")
</pallas_src>

<mosaic_0001>
module attributes {stable_mosaic.version = 11 : i64} {
  func.func @_tversky_bce_kernel(%arg0: i32, %arg1: i32, %arg2: memref<8x512xf32, #tpu.memory_space<vmem>>, %arg3: memref<8x512xf32, #tpu.memory_space<vmem>>, %arg4: memref<1x4x8x128xf32, #tpu.memory_space<vmem>>, %arg5: memref<4x8x128xf32, #tpu.memory_space<vmem>>) attributes {dimension_semantics = [#tpu.dimension_semantics<parallel>, #tpu.dimension_semantics<arbitrary>], iteration_bounds = array<i64: 1, 1>, scalar_prefetch = 0 : i64, scratch_operands = 1 : i64, tpu.core_type = #tpu.core_type<tc>, window_params = [{transform_indices = @transform_0, window_bounds = array<i64: 8, 512>}, {transform_indices = @transform_1, window_bounds = array<i64: 8, 512>}, {transform_indices = @transform_2, window_bounds = array<i64: 1, 4, 8, 128>}]} {
    %c0_i32 = arith.constant 0 : i32
    %0 = arith.cmpi eq, %arg1, %c0_i32 : i32
    %1 = arith.extui %0 : i1 to i32
    %c0_i32_0 = arith.constant 0 : i32
    %2 = arith.cmpi ne, %1, %c0_i32_0 : i32
    scf.if %2 {
      %cst_29 = arith.constant 0.000000e+00 : f32
      %72 = vector.broadcast %cst_29 : f32 to vector<4x8x128xf32>
      %c0_30 = arith.constant 0 : index
      %c0_31 = arith.constant 0 : index
      %c0_32 = arith.constant 0 : index
      %73 = vector.load %arg5[%c0_30, %c0_31, %c0_32] : memref<4x8x128xf32, #tpu.memory_space<vmem>>, vector<4x8x128xf32>
      tpu.vector_store %arg5[%c0_30, %c0_31, %c0_32], %72 {strides = array<i32>} : memref<4x8x128xf32, #tpu.memory_space<vmem>>, vector<4x8x128xf32>,
    } else {
    }
    %c0 = arith.constant 0 : index
    %c0_1 = arith.constant 0 : index
    %3 = vector.load %arg2[%c0, %c0_1] : memref<8x512xf32, #tpu.memory_space<vmem>>, vector<8x512xf32>
    %c0_2 = arith.constant 0 : index
    %c0_3 = arith.constant 0 : index
    %4 = vector.load %arg3[%c0_2, %c0_3] : memref<8x512xf32, #tpu.memory_space<vmem>>, vector<8x512xf32>
    %5 = arith.mulf %3, %4 : vector<8x512xf32>
    %cst = arith.constant 0.000000e+00 : f32
    %6 = vector.broadcast %cst : f32 to vector<8x512xf32>
    %7 = arith.maximumf %3, %6 : vector<8x512xf32>
    %8 = arith.subf %7, %5 : vector<8x512xf32>
    %9 = math.absf %3 : vector<8x512xf32>
    %cst_4 = arith.constant 0.000000e+00 : f32
    %10 = vector.broadcast %cst_4 : f32 to vector<8x512xf32>
    %11 = arith.subf %10, %9 : vector<8x512xf32>
    %12 = math.exp %11 : vector<8x512xf32>
    %cst_5 = arith.constant 1.000000e+00 : f32
    %13 = vector.broadcast %cst_5 : f32 to vector<8x512xf32>
    %14 = arith.addf %13, %12 : vector<8x512xf32>
    %15 = math.log %14 : vector<8x512xf32>
    %16 = arith.addf %8, %15 : vector<8x512xf32>
    %c0_6 = arith.constant 0 : index
    %c0_7 = arith.constant 0 : index
    %c0_8 = arith.constant 0 : index
    %17 = vector.load %arg5[%c0_6, %c0_7, %c0_8] : memref<4x8x128xf32, #tpu.memory_space<vmem>>, vector<1x8x128xf32>
    %18 = vector.shape_cast %17 : vector<1x8x128xf32> to vector<8x128xf32>
    %19 = vector.extract_strided_slice %5 {offsets = [0, 0], sizes = [8, 128], strides = [1, 1]} : vector<8x512xf32> to vector<8x128xf32>
    %20 = vector.extract_strided_slice %5 {offsets = [0, 128], sizes = [8, 128], strides = [1, 1]} : vector<8x512xf32> to vector<8x128xf32>
    %21 = vector.extract_strided_slice %5 {offsets = [0, 256], sizes = [8, 128], strides = [1, 1]} : vector<8x512xf32> to vector<8x128xf32>
    %22 = vector.extract_strided_slice %5 {offsets = [0, 384], sizes = [8, 128], strides = [1, 1]} : vector<8x512xf32> to vector<8x128xf32>
    %23 = arith.addf %19, %20 : vector<8x128xf32>
    %24 = arith.addf %21, %22 : vector<8x128xf32>
    %25 = arith.addf %23, %24 : vector<8x128xf32>
    %26 = arith.addf %18, %25 : vector<8x128xf32>
    %c0_9 = arith.constant 0 : index
    %c0_10 = arith.constant 0 : index
    %c0_11 = arith.constant 0 : index
    %27 = vector.load %arg5[%c0_9, %c0_10, %c0_11] : memref<4x8x128xf32, #tpu.memory_space<vmem>>, vector<1x8x128xf32>
    %28 = vector.shape_cast %27 : vector<1x8x128xf32> to vector<8x128xf32>
    %29 = vector.shape_cast %26 : vector<8x128xf32> to vector<1x8x128xf32>
    tpu.vector_store %arg5[%c0_9, %c0_10, %c0_11], %29 {strides = array<i32>} : memref<4x8x128xf32, #tpu.memory_space<vmem>>, vector<1x8x128xf32>,
    %c1 = arith.constant 1 : index
    %c0_12 = arith.constant 0 : index
    %c0_13 = arith.constant 0 : index
    %30 = vector.load %arg5[%c1, %c0_12, %c0_13] : memref<4x8x128xf32, #tpu.memory_space<vmem>>, vector<1x8x128xf32>
    %31 = vector.shape_cast %30 : vector<1x8x128xf32> to vector<8x128xf32>
    %32 = vector.extract_strided_slice %3 {offsets = [0, 0], sizes = [8, 128], strides = [1, 1]} : vector<8x512xf32> to vector<8x128xf32>
    %33 = vector.extract_strided_slice %3 {offsets = [0, 128], sizes = [8, 128], strides = [1, 1]} : vector<8x512xf32> to vector<8x128xf32>
    %34 = vector.extract_strided_slice %3 {offsets = [0, 256], sizes = [8, 128], strides = [1, 1]} : vector<8x512xf32> to vector<8x128xf32>
    %35 = vector.extract_strided_slice %3 {offsets = [0, 384], sizes = [8, 128], strides = [1, 1]} : vector<8x512xf32> to vector<8x128xf32>
    %36 = arith.addf %32, %33 : vector<8x128xf32>
    %37 = arith.addf %34, %35 : vector<8x128xf32>
    %38 = arith.addf %36, %37 : vector<8x128xf32>
    %39 = arith.addf %31, %38 : vector<8x128xf32>
    %c1_14 = arith.constant 1 : index
    %c0_15 = arith.constant 0 : index
    %c0_16 = arith.constant 0 : index
    %40 = vector.load %arg5[%c1_14, %c0_15, %c0_16] : memref<4x8x128xf32, #tpu.memory_space<vmem>>, vector<1x8x128xf32>
    %41 = vector.shape_cast %40 : vector<1x8x128xf32> to vector<8x128xf32>
    %42 = vector.shape_cast %39 : vector<8x128xf32> to vector<1x8x128xf32>
    tpu.vector_store %arg5[%c1_14, %c0_15, %c0_16], %42 {strides = array<i32>} : memref<4x8x128xf32, #tpu.memory_space<vmem>>, vector<1x8x128xf32>,
    %c2 = arith.constant 2 : index
    %c0_17 = arith.constant 0 : index
    %c0_18 = arith.constant 0 : index
    %43 = vector.load %arg5[%c2, %c0_17, %c0_18] : memref<4x8x128xf32, #tpu.memory_space<vmem>>, vector<1x8x128xf32>
    %44 = vector.shape_cast %43 : vector<1x8x128xf32> to vector<8x128xf32>
    %45 = vector.extract_strided_slice %4 {offsets = [0, 0], sizes = [8, 128], strides = [1, 1]} : vector<8x512xf32> to vector<8x128xf32>
    %46 = vector.extract_strided_slice %4 {offsets = [0, 128], sizes = [8, 128], strides = [1, 1]} : vector<8x512xf32> to vector<8x128xf32>
    %47 = vector.extract_strided_slice %4 {offsets = [0, 256], sizes = [8, 128], strides = [1, 1]} : vector<8x512xf32> to vector<8x128xf32>
    %48 = vector.extract_strided_slice %4 {offsets = [0, 384], sizes = [8, 128], strides = [1, 1]} : vector<8x512xf32> to vector<8x128xf32>
    %49 = arith.addf %45, %46 : vector<8x128xf32>
    %50 = arith.addf %47, %48 : vector<8x128xf32>
    %51 = arith.addf %49, %50 : vector<8x128xf32>
    %52 = arith.addf %44, %51 : vector<8x128xf32>
    %c2_19 = arith.constant 2 : index
    %c0_20 = arith.constant 0 : index
    %c0_21 = arith.constant 0 : index
    %53 = vector.load %arg5[%c2_19, %c0_20, %c0_21] : memref<4x8x128xf32, #tpu.memory_space<vmem>>, vector<1x8x128xf32>
    %54 = vector.shape_cast %53 : vector<1x8x128xf32> to vector<8x128xf32>
    %55 = vector.shape_cast %52 : vector<8x128xf32> to vector<1x8x128xf32>
    tpu.vector_store %arg5[%c2_19, %c0_20, %c0_21], %55 {strides = array<i32>} : memref<4x8x128xf32, #tpu.memory_space<vmem>>, vector<1x8x128xf32>,
    %c3 = arith.constant 3 : index
    %c0_22 = arith.constant 0 : index
    %c0_23 = arith.constant 0 : index
    %56 = vector.load %arg5[%c3, %c0_22, %c0_23] : memref<4x8x128xf32, #tpu.memory_space<vmem>>, vector<1x8x128xf32>
    %57 = vector.shape_cast %56 : vector<1x8x128xf32> to vector<8x128xf32>
    %58 = vector.extract_strided_slice %16 {offsets = [0, 0], sizes = [8, 128], strides = [1, 1]} : vector<8x512xf32> to vector<8x128xf32>
    %59 = vector.extract_strided_slice %16 {offsets = [0, 128], sizes = [8, 128], strides = [1, 1]} : vector<8x512xf32> to vector<8x128xf32>
    %60 = vector.extract_strided_slice %16 {offsets = [0, 256], sizes = [8, 128], strides = [1, 1]} : vector<8x512xf32> to vector<8x128xf32>
    %61 = vector.extract_strided_slice %16 {offsets = [0, 384], sizes = [8, 128], strides = [1, 1]} : vector<8x512xf32> to vector<8x128xf32>
    %62 = arith.addf %58, %59 : vector<8x128xf32>
    %63 = arith.addf %60, %61 : vector<8x128xf32>
    %64 = arith.addf %62, %63 : vector<8x128xf32>
    %65 = arith.addf %57, %64 : vector<8x128xf32>
    %c3_24 = arith.constant 3 : index
    %c0_25 = arith.constant 0 : index
    %c0_26 = arith.constant 0 : index
    %66 = vector.load %arg5[%c3_24, %c0_25, %c0_26] : memref<4x8x128xf32, #tpu.memory_space<vmem>>, vector<1x8x128xf32>
    %67 = vector.shape_cast %66 : vector<1x8x128xf32> to vector<8x128xf32>
    %68 = vector.shape_cast %65 : vector<8x128xf32> to vector<1x8x128xf32>
    tpu.vector_store %arg5[%c3_24, %c0_25, %c0_26], %68 {strides = array<i32>} : memref<4x8x128xf32, #tpu.memory_space<vmem>>, vector<1x8x128xf32>,
    %c0_i32_27 = arith.constant 0 : i32
    %69 = arith.cmpi eq, %arg1, %c0_i32_27 : i32
    %70 = arith.extui %69 : i1 to i32
    %c0_i32_28 = arith.constant 0 : i32
    %71 = arith.cmpi ne, %70, %c0_i32_28 : i32
    scf.if %71 {
      %c0_29 = arith.constant 0 : index
      %c0_30 = arith.constant 0 : index
      %c0_31 = arith.constant 0 : index
      %72 = vector.load %arg5[%c0_29, %c0_30, %c0_31] : memref<4x8x128xf32, #tpu.memory_space<vmem>>, vector<4x8x128xf32>
      %c0_32 = arith.constant 0 : index
      %c0_33 = arith.constant 0 : index
      %c0_34 = arith.constant 0 : index
      %c0_35 = arith.constant 0 : index
      %73 = vector.load %arg4[%c0_32, %c0_33, %c0_34, %c0_35] : memref<1x4x8x128xf32, #tpu.memory_space<vmem>>, vector<1x4x8x128xf32>
      %74 = vector.shape_cast %73 : vector<1x4x8x128xf32> to vector<4x8x128xf32>
      %75 = vector.shape_cast %72 : vector<4x8x128xf32> to vector<1x4x8x128xf32>
      tpu.vector_store %arg4[%c0_32, %c0_33, %c0_34, %c0_35], %75 {strides = array<i32>} : memref<1x4x8x128xf32, #tpu.memory_space<vmem>>, vector<1x4x8x128xf32>,
    } else {
    }
    return
  }
  func.func @transform_0(%arg0: i32, %arg1: i32) -> (i32, i32) {
    %c1_i32 = arith.constant 1 : i32
    %0 = arith.muli %arg0, %c1_i32 : i32
    %1 = arith.addi %0, %arg1 : i32
    %c0_i32 = arith.constant 0 : i32
    %c0_i32_0 = arith.constant 0 : i32
    return %c0_i32, %1 : i32, i32
  }
  func.func @transform_1(%arg0: i32, %arg1: i32) -> (i32, i32) {
    %c1_i32 = arith.constant 1 : i32
    %0 = arith.muli %arg0, %c1_i32 : i32
    %1 = arith.addi %0, %arg1 : i32
    %c0_i32 = arith.constant 0 : i32
    %c0_i32_0 = arith.constant 0 : i32
    return %c0_i32, %1 : i32, i32
  }
  func.func @transform_2(%arg0: i32, %arg1: i32) -> (i32, i32, i32, i32) {
    %c0_i32 = arith.constant 0 : i32
    %c0_i32_0 = arith.constant 0 : i32
    %c0_i32_1 = arith.constant 0 : i32
    %c0_i32_2 = arith.constant 0 : i32
    return %arg0, %c0_i32, %c0_i32_0, %c0_i32_1 : i32, i32, i32, i32
  }
}

</mosaic_0001>

<bundles_post_ra>
// kernel: tpu_custom_call.1
= control target key start
LH: loop header
LB: loop body
LE: loop exit
PB: predicated region body
PF: predicated region fallthrough
CT: control target
= control target key end

     0   :  { %7 = vsyncpa [#allocation4], 0  ;;  %s298_s0 = inlined_call_operand.hbm [shape: f32[8,512], index: 0, kind: input, shape index: {}]   ;;  %s299_s1 = inlined_call_operand.hbm [shape: f32[8,512], index: 1, kind: input, shape index: {}]   ;;  %s300_s2 = inlined_call_operand.hbm [shape: f32[1,4,8,128], index: 2, kind: output, shape index: {}]  }
   0x1   :  { %8 = vsyncpa [#allocation7], 0 }
   0x2   :  { %9 = vsyncpa [#allocation5], 0  ;;  %s19_s11 = sshll.u32 %s298_s0, 4  ;;  %s269_s12 = smov [#allocation3]   ;;  %s20_s11 = int_to_ptr.hbm [resolvable:$true] %s19_s11 }
   0x3   :  { %s21_s13 = sshll.u32 %s269_s12, 4  ;;  %s34_s16 = sshll.u32 %s299_s1, 4  ;;  %s22_s13 = int_to_ptr.vmem [resolvable:$true] %s21_s13  ;;  %s35_s16 = int_to_ptr.hbm [resolvable:$true] %s34_s16 }
   0x4   :  { %24 = dma.hbm_to_vmem [thread:$0]  %s20_s11, 512, %s22_s13, [#allocation4]  }
   0x5   :  { %s270_s17 = smov [#allocation6]  }
   0x6   :  { %s36_s18 = sshll.u32 %s270_s17, 4  ;;  %s37_s18 = int_to_ptr.vmem [resolvable:$true] %s36_s18 }
   0x7   :  { %39 = dma.hbm_to_vmem [thread:$0]  %s35_s16, 512, %s37_s18, [#allocation7]  }
   0x8   :  { %263 = dma.done.wait [#allocation4], 512  }
   0x9   :  { %264 = vsyncadd [#allocation4], 4294966784 }
   0xa   :  { %265 = dma.done.wait [#allocation7], 512  }
   0xb   :  { %266 = vsyncadd [#allocation7], 4294966784  ;;  %v60_v0 = vld [vmem:[#allocation3] sm:$0xff]  ;;  %v61_v1 = vld [vmem:[#allocation3 + $0x8] sm:$0xff]  ;;  %s271_s0 = smov [#allocation8]   ;;  %s156_s21 = sshll.u32 %s300_s2, 4  ;;  %s157_s21 = int_to_ptr.hbm [resolvable:$true] %s156_s21 }
   0xc   :  { %v62_v2 = vld [vmem:[#allocation3 + $0x10] sm:$0xff]  ;;  %v63_v3 = vld [vmem:[#allocation3 + $0x18] sm:$0xff]  ;;  %v64_v4 = vld [vmem:[#allocation6] sm:$0xff]  ;;  %v120_v6 = vadd.f32 %v61_v1, %v60_v0  ;;  %v80_v20 = vand.u32 2147483647, %v60_v0  ;;  %v72_v40 = vmax.f32 %v60_v0, 0.0 }
   0xd   :  { %v65_v5 = vld [vmem:[#allocation6 + $0x8] sm:$0xff]  ;;  %v66_v7 = vld [vmem:[#allocation6 + $0x10] sm:$0xff]  ;;  %v67_v8 = vld [vmem:[#allocation6 + $0x18] sm:$0xff]  ;;  %v68_v9 = vmul.f32 %v64_v4, %v60_v0  ;;  %v121_v11 = vadd.f32 %v63_v3, %v62_v2  ;;  %v81_v21 = vand.u32 2147483647, %v61_v1  ;;  %v73_v42 = vmax.f32 %v61_v1, 0.0 }
   0xe   :  { %v69_v10 = vmul.f32 %v65_v5, %v61_v1  ;;  %v127_v12 = vadd.f32 %v65_v5, %v64_v4  ;;  %v70_v13 = vmul.f32 %v66_v7, %v62_v2  ;;  %v71_v14 = vmul.f32 %v67_v8, %v63_v3  ;;  %s154_s1 = sshll.u32 %s271_s0, 4  ;;  %s272_s22 = smov 128   ;;  %s155_s1 = int_to_ptr.vmem [resolvable:$true] %s154_s1 }
   0xf   :  { %v128_v15 = vadd.f32 %v67_v8, %v66_v7  ;;  %v122_v17 = vadd.f32 %v121_v11, %v120_v6  ;;  %v82_v23 = vand.u32 2147483647, %v62_v2  ;;  %v83_v24 = vand.u32 2147483647, %v63_v3  ;;  %s273_s23 = smov 8  }
  0x10   :  { %v113_v16 = vadd.f32 %v69_v10, %v68_v9  ;;  %v114_v18 = vadd.f32 %v71_v14, %v70_v13  ;;  %v84_v25 = vsub.f32 0.0, %v80_v20  ;;  %v85_v26 = vsub.f32 0.0, %v81_v21 }
  0x11   :  { %v129_v19 = vadd.f32 %v128_v15, %v127_v12  ;;  %147 = vst [vmem:[#allocation8 + $0x8] sm:$0xff] %v122_v17  ;;  %v86_v27 = vsub.f32 0.0, %v82_v23  ;;  %v87_v28 = vsub.f32 0.0, %v83_v24  ;;  %v74_v43 = vmax.f32 %v62_v2, 0.0 }
  0x12   :  { %v115_v22 = vadd.f32 %v114_v18, %v113_v16  ;;  %v88_v29 = vmul.f32 1.442695, %v84_v25  ;;  %v90_v30 = vmul.f32 1.442695, %v85_v26  ;;  %v75_v44 = vmax.f32 %v63_v3, 0.0 }
  0x13   :  { %148 = vst [vmem:[#allocation8 + $0x10] sm:$0xff] %v129_v19  ;;  %v92_v31 = vmul.f32 1.442695, %v86_v27  ;;  %v94_v32 = vmul.f32 1.442695, %v87_v28  ;;  %v76_v45 = vsub.f32 %v72_v40, %v68_v9  ;;  %v77_v47 = vsub.f32 %v73_v42, %v69_v10 }
  0x14   :  { %146 = vst [vmem:[#allocation8] sm:$0xff] %v115_v22  ;;  %175 = vpow2.f32 %v88_v29  ;;  %v78_v49 = vsub.f32 %v74_v43, %v70_v13  ;;  %v79_v52 = vsub.f32 %v75_v44, %v71_v14 }
  0x15   :  { %177 = vpow2.f32 %v90_v30 }
  0x16   :  { %179 = vpow2.f32 %v92_v31 }
  0x17   :  { %181 = vpow2.f32 %v94_v32 }
  0x1a   :  { %v176_v33 = vpop.eup %175 }
  0x1b   :  { %v178_v34 = vpop.eup %177  ;;  %v96_v35 = vadd.f32 1.0, %v176_v33 }
  0x1c   :  { %v180_v36 = vpop.eup %179  ;;  %v97_v37 = vadd.f32 1.0, %v178_v34 }
  0x1d   :  { %v182_v38 = vpop.eup %181  ;;  %v98_v39 = vadd.f32 1.0, %v180_v36  ;;  %183 = vlog2.f32 %v96_v35 }
  0x1e   :  { %v99_v41 = vadd.f32 1.0, %v182_v38  ;;  %185 = vlog2.f32 %v97_v37 }
  0x1f   :  { %187 = vlog2.f32 %v98_v39 }
  0x20   :  { %189 = vlog2.f32 %v99_v41 }
  0x23   :  { %v184_v46 = vpop.eup %183 }
  0x24   :  { %v186_v48 = vpop.eup %185  ;;  %v101_v50 = vmul.f32 0.6931472, %v184_v46 }
  0x25   :  { %v188_v51 = vpop.eup %187  ;;  %v103_v53 = vmul.f32 0.6931472, %v186_v48 }
  0x26   :  { %v190_v54 = vpop.eup %189  ;;  %v105_v55 = vmul.f32 0.6931472, %v188_v51  ;;  %v108_v56 = vadd.f32 %v101_v50, %v76_v45 }
  0x27   :  { %v107_v57 = vmul.f32 0.6931472, %v190_v54  ;;  %v109_v58 = vadd.f32 %v103_v53, %v77_v47 }
  0x28   :  { %v110_v59 = vadd.f32 %v105_v55, %v78_v49 }
  0x29   :  { %v111_v60 = vadd.f32 %v107_v57, %v79_v52  ;;  %v134_v61 = vadd.f32 %v109_v58, %v108_v56 }
  0x2b   :  { %v135_v62 = vadd.f32 %v111_v60, %v110_v59 }
  0x2d   :  { %v136_v63 = vadd.f32 %v135_v62, %v134_v61 }
  0x2f   :  { %149 = vst [vmem:[#allocation8 + $0x18] sm:$0xff] %v136_v63 }
  0x30   :  { %162 = dma.vmem_to_hbm [thread:$0]  %s155_s1, 512, %s157_s21, [#allocation5], %s272_s22, %s272_s22, %s273_s23  }
  0x31   :  { %267 = dma.done.wait [#allocation5], 512  }
  0x32   :  { %268 = vsyncadd [#allocation5], 4294966784 }
  0x33   :  { %167 = vsyncpa [#allocation4], 1 }
  0x34   :  { %168 = vsyncpa [#allocation7], 1 }
  0x35   :  { %169 = vsyncpa [#allocation5], 1 }

</bundles_post_ra>
